<compile_context>
chip_gen: v5e
topology: v5e:2x2
jax: 0.10.0
libtpu: 0.0.40
codegen_flags: <defaults>
</compile_context>

<pallas_src>
import functools

import jax
import jax.numpy as jnp
import numpy as np
from jax.experimental import pallas as pl
from jax.experimental.pallas import tpu as pltpu


def _round_up(x, m):
    return ((x + m - 1) // m) * m


def _auto_tile_m(n_rows, n_classes, itemsize, vmem_budget_bytes,
                 extra_bytes=0):
    """Largest safe row tile: accounts for the double-buffered native preds
    block plus ~4 (tile_m, C)-sized f32 temporaries live in the body."""
    F32_TEMPS = 4  # shifted, exp(shifted), gather-select result, headroom
    bytes_per_row = max(1, n_classes * (2 * itemsize + F32_TEMPS * 4))
    avail = max(0, vmem_budget_bytes - extra_bytes)
    max_rows = max(1, avail // bytes_per_row)
    tile_m = max(8, (max_rows // 8) * 8)            # sublane multiple
    tile_m = min(tile_m, 256)                       # overhead already amortized
    if n_rows > 8:
        # Guarantee >= 2 grid steps so both v7x TensorCores get work.
        tile_m = min(tile_m, _round_up(-(-n_rows // 2), 8))
    tile_m = min(tile_m, _round_up(n_rows, 8))      # don't exceed the data
    return max(8, tile_m)


def _ls_ce_partial_kernel(preds_ref, target_ref, out_ref, *,
                          n_rows, tile_m, n_classes, use_mxu_lane_sums):
    pid = pl.program_id(0)

    x = preds_ref[...]                              # (TM, C) native dtype
    t = target_ref[...]                             # (TM, 1) int32

    # Numerically-stable shifted logits.  row max is exact in the native
    # dtype; `shifted` is the only full-tile f32 temporary we need.
    row_max = jnp.max(x, axis=-1, keepdims=True).astype(jnp.float32)  # (TM,1)
    shifted = x.astype(jnp.float32) - row_max                         # (TM,C) <= 0

    exp_shifted = jnp.exp(shifted)                                    # EUP

    if use_mxu_lane_sums:
        # Plain lane sums on the otherwise-idle MXU (frees the VALU slot).
        ones = jnp.ones((n_classes, 128), dtype=jnp.float32)
        sum_exp = jnp.dot(exp_shifted, ones,
                          preferred_element_type=jnp.float32)[:, 0:1]
        sum_shifted = jnp.dot(shifted, ones,
                              preferred_element_type=jnp.float32)[:, 0:1]
    else:
        sum_exp = jnp.sum(exp_shifted, axis=-1, keepdims=True)        # (TM,1)
        sum_shifted = jnp.sum(shifted, axis=-1, keepdims=True)        # (TM,1)

    log_sum_exp = jnp.log(sum_exp)                                    # (TM,1)

    # Gather shifted[i, t_i] with a (1, C) lane iota (no full-tile int32 iota).
    lane = jax.lax.broadcasted_iota(jnp.int32, (1, n_classes), 1)     # (1, C)
    shifted_t = jnp.sum(jnp.where(lane == t, shifted, 0.0),
                        axis=-1, keepdims=True)                       # (TM,1)

    #   -sum_c logp = C*log_sum_exp - sum_shifted     (cancellation-free)
    #   nll_i       = log_sum_exp - shifted_t
    neg_sum_row = jnp.float32(n_classes) * log_sum_exp - sum_shifted
    nll_row = log_sum_exp - shifted_t

    # Mask rows past n_rows (last, possibly partial, tile).  Keep this a true
    # select (NOT a multiply) so NaN/Inf garbage in padded rows is discarded.
    row_idx = pid * tile_m + jax.lax.broadcasted_iota(
        jnp.int32, (tile_m, 1), 0)
    valid = row_idx < n_rows
    neg_sum_tile = jnp.sum(jnp.where(valid, neg_sum_row, 0.0))        # scalar
    nll_tile = jnp.sum(jnp.where(valid, nll_row, 0.0))                # scalar

    # Per-tile partials written as a full (8, 128) tile: lane 0 = sum_neg,
    # lane 1 = nll, everything else 0 (unmasked store, aligned writeback).
    out_lane = jax.lax.broadcasted_iota(jnp.int32, (1, 8, 128), 2)
    out_ref[...] = jnp.where(
        out_lane == 0, neg_sum_tile,
        jnp.where(out_lane == 1, nll_tile, jnp.float32(0.0)))


def label_smoothing_cross_entropy(preds, target, *, epsilon=0.1,
                                  reduction="mean", tile_m=None,
                                  vmem_limit_bytes=None):
    """Pallas TPU implementation of LabelSmoothingCrossEntropy.forward."""
    assert reduction in ("mean", "sum")
    n_rows, n_classes = preds.shape

    # Scoped-VMEM request: <= 40 MiB, and never more than half the physical
    # per-core VMEM (v7x has only 64 MiB/TC).
    if vmem_limit_bytes is None:
        try:
            cap = pltpu.get_tpu_info().vmem_capacity_bytes
        except Exception:
            cap = 64 * 1024 * 1024
        vmem_limit_bytes = min(40 * 1024 * 1024,
                               max(16 * 1024 * 1024, cap // 2))

    # MXU-offloaded lane sums only when the ones constant is cheap.
    ones_bytes = n_classes * 128 * 4
    use_mxu_lane_sums = ones_bytes <= 2 * 1024 * 1024

    if tile_m is None:
        itemsize = jnp.dtype(preds.dtype).itemsize
        # Leave ~8 MiB headroom for the target blocks, output blocks and
        # compiler-internal scratch.
        tile_budget = max(4 * 1024 * 1024, vmem_limit_bytes - 8 * 1024 * 1024)
        tile_m = _auto_tile_m(n_rows, n_classes, itemsize, tile_budget,
                              extra_bytes=ones_bytes if use_mxu_lane_sums else 0)

    n_tiles = -(-n_rows // tile_m)
    target2d = target.reshape(n_rows, 1).astype(jnp.int32)

    kernel = functools.partial(
        _ls_ce_partial_kernel,
        n_rows=n_rows,
        tile_m=tile_m,
        n_classes=n_classes,
        use_mxu_lane_sums=use_mxu_lane_sums,
    )

    partials = pl.pallas_call(
        kernel,
        out_shape=jax.ShapeDtypeStruct((n_tiles, 8, 128), jnp.float32),
        grid_spec=pltpu.PrefetchScalarGridSpec(
            num_scalar_prefetch=0,
            grid=(n_tiles,),
            in_specs=[
                pl.BlockSpec((tile_m, n_classes), lambda i: (i, 0)),
                pl.BlockSpec((tile_m, 1), lambda i: (i, 0)),
            ],
            out_specs=pl.BlockSpec((1, 8, 128), lambda i: (i, 0, 0)),
        ),
        compiler_params=pltpu.CompilerParams(
            dimension_semantics=("parallel",),
            vmem_limit_bytes=vmem_limit_bytes),
    )(preds, target2d)

    # Tiny final reduction + epsilon blend in plain JAX (negligible cost).
    sum_neg = jnp.sum(partials[:, 0, 0])
    nll_sum = jnp.sum(partials[:, 0, 1])
    denom = jnp.float32(n_rows) if reduction == "mean" else jnp.float32(1.0)
    loss = sum_neg / denom
    nll = nll_sum / denom
    return (jnp.float32(epsilon) * (loss / jnp.float32(n_classes))
            + jnp.float32(1.0 - epsilon) * nll)


def _reference(preds, target, epsilon=0.1, reduction="mean"):
    """Pure-JAX reference mirroring the PyTorch module."""
    n = preds.shape[-1]
    logp = jax.nn.log_softmax(preds.astype(jnp.float32), axis=-1)
    per_row = -jnp.sum(logp, axis=-1)
    nll_row = -logp[jnp.arange(preds.shape[0]), target]
    if reduction == "mean":
        loss, nll = jnp.mean(per_row), jnp.mean(nll_row)
    else:
        loss, nll = jnp.sum(per_row), jnp.sum(nll_row)
    return epsilon * (loss / n) + (1.0 - epsilon) * nll


if __name__ == "__main__":
    key = jax.random.PRNGKey(0)
    k1, k2, k3, k4 = jax.random.split(key, 4)

    # Case 1: small demo (batch=16, classes=32), f32, reduction='mean'.
    preds = jax.random.normal(k1, (16, 32), dtype=jnp.float32)
    target = jax.random.randint(k2, (16,), 0, 32, dtype=jnp.int32)
    out = jax.block_until_ready(
        label_smoothing_cross_entropy(preds, target, epsilon=0.1,
                                      reduction="mean"))
    ref = _reference(preds, target, epsilon=0.1, reduction="mean")
    assert np.allclose(np.asarray(out), np.asarray(ref),
                       rtol=1e-4, atol=1e-4), f"mismatch: {out} vs {ref}"

    # Case 2: non-multiple-of-128 class count, partial last row tile,
    # reduction='sum' (exercises lane padding + row-validity mask).
    preds2 = jax.random.normal(k3, (19, 130), dtype=jnp.float32)
    target2 = jax.random.randint(k4, (19,), 0, 130, dtype=jnp.int32)
    out2 = jax.block_until_ready(
        label_smoothing_cross_entropy(preds2, target2, epsilon=0.2,
                                      reduction="sum"))
    ref2 = _reference(preds2, target2, epsilon=0.2, reduction="sum")
    assert np.allclose(np.asarray(out2), np.asarray(ref2),
                       rtol=1e-4, atol=1e-4), f"mismatch: {out2} vs {ref2}"

    print("KERNEL_OK")
</pallas_src>

<mosaic_0001>
module attributes {stable_mosaic.version = 11 : i64} {
  func.func @_ls_ce_partial_kernel(%arg0: i32, %arg1: memref<8x32xf32, #tpu.memory_space<vmem>>, %arg2: memref<8x1xi32, #tpu.memory_space<vmem>>, %arg3: memref<1x8x128xf32, #tpu.memory_space<vmem>>) attributes {dimension_semantics = [#tpu.dimension_semantics<parallel>], iteration_bounds = array<i64: 2>, scalar_prefetch = 0 : i64, scratch_operands = 0 : i64, tpu.core_type = #tpu.core_type<tc>, window_params = [{transform_indices = @transform_0, window_bounds = array<i64: 8, 32>}, {transform_indices = @transform_1, window_bounds = array<i64: 8, 1>}, {transform_indices = @transform_2, window_bounds = array<i64: 1, 8, 128>}]} {
    %c0 = arith.constant 0 : index
    %c0_0 = arith.constant 0 : index
    %0 = vector.load %arg1[%c0, %c0_0] : memref<8x32xf32, #tpu.memory_space<vmem>>, vector<8x32xf32>
    %c0_1 = arith.constant 0 : index
    %c0_2 = arith.constant 0 : index
    %1 = vector.load %arg2[%c0_1, %c0_2] : memref<8x1xi32, #tpu.memory_space<vmem>>, vector<8x1xi32>
    %cst = arith.constant dense<0xFF800000> : vector<8xf32>
    %2 = vector.multi_reduction <maximumf>, %0, %cst [1] : vector<8x32xf32> to vector<8xf32>
    %3 = vector.shape_cast %2 : vector<8xf32> to vector<8x1xf32>
    %4 = vector.broadcast %3 : vector<8x1xf32> to vector<8x32xf32>
    %5 = arith.subf %0, %4 : vector<8x32xf32>
    %6 = math.exp %5 : vector<8x32xf32>
    %cst_3 = arith.constant 1.000000e+00 : f32
    %7 = vector.broadcast %cst_3 : f32 to vector<32x128xf32>
    %cst_4 = arith.constant dense<0.000000e+00> : vector<8x128xf32>
    %8 = tpu.matmul %6, %7, %cst_4 {dimension_numbers = #tpu.dot_dimension_numbers<[1], [0], [0], [1], [0, 0, 1, 1], [], []>} : vector<8x32xf32>, vector<32x128xf32>, vector<8x128xf32> -> vector<8x128xf32>
    %9 = vector.extract_strided_slice %8 {offsets = [0, 0], sizes = [8, 1], strides = [1, 1]} : vector<8x128xf32> to vector<8x1xf32>
    %cst_5 = arith.constant dense<0.000000e+00> : vector<8x128xf32>
    %10 = tpu.matmul %5, %7, %cst_5 {dimension_numbers = #tpu.dot_dimension_numbers<[1], [0], [0], [1], [0, 0, 1, 1], [], []>} : vector<8x32xf32>, vector<32x128xf32>, vector<8x128xf32> -> vector<8x128xf32>
    %11 = vector.extract_strided_slice %10 {offsets = [0, 0], sizes = [8, 1], strides = [1, 1]} : vector<8x128xf32> to vector<8x1xf32>
    %12 = math.log %9 : vector<8x1xf32>
    %13 = tpu.iota {dimensions = array<i32: 1>} : vector<1x32xi32>
    %14 = vector.broadcast %13 : vector<1x32xi32> to vector<8x32xi32>
    %15 = vector.broadcast %1 : vector<8x1xi32> to vector<8x32xi32>
    %16 = arith.cmpi eq, %14, %15 : vector<8x32xi32>
    %cst_6 = arith.constant 0.000000e+00 : f32
    %17 = vector.broadcast %cst_6 : f32 to vector<8x32xf32>
    %18 = arith.select %16, %5, %17 : vector<8x32xi1>, vector<8x32xf32>
    %cst_7 = arith.constant dense<0.000000e+00> : vector<8xf32>
    %19 = vector.multi_reduction <add>, %18, %cst_7 [1] : vector<8x32xf32> to vector<8xf32>
    %20 = vector.shape_cast %19 : vector<8xf32> to vector<8x1xf32>
    %cst_8 = arith.constant 3.200000e+01 : f32
    %21 = vector.broadcast %cst_8 : f32 to vector<8x1xf32>
    %22 = arith.mulf %21, %12 : vector<8x1xf32>
    %23 = arith.subf %22, %11 : vector<8x1xf32>
    %24 = arith.subf %12, %20 : vector<8x1xf32>
    %c8_i32 = arith.constant 8 : i32
    %25 = arith.muli %arg0, %c8_i32 : i32
    %26 = tpu.iota {dimensions = array<i32: 0>} : vector<8x1xi32>
    %27 = vector.broadcast %25 : i32 to vector<8x1xi32>
    %28 = arith.addi %27, %26 : vector<8x1xi32>
    %c16_i32 = arith.constant 16 : i32
    %29 = vector.broadcast %c16_i32 : i32 to vector<8x1xi32>
    %30 = arith.cmpi slt, %28, %29 : vector<8x1xi32>
    %cst_9 = arith.constant 0.000000e+00 : f32
    %31 = vector.broadcast %cst_9 : f32 to vector<8x1xf32>
    %32 = arith.select %30, %23, %31 : vector<8x1xi1>, vector<8x1xf32>
    %33 = vector.shape_cast %32 : vector<8x1xf32> to vector<1x8x1xf32>
    %cst_10 = arith.constant dense<0.000000e+00> : vector<1xf32>
    %34 = vector.multi_reduction <add>, %33, %cst_10 [1, 2] : vector<1x8x1xf32> to vector<1xf32>
    %35 = vector.shape_cast %34 : vector<1xf32> to vector<1x1x1xf32>
    %36 = vector.extract %35[0, 0, 0] : f32 from vector<1x1x1xf32>
    %cst_11 = arith.constant 0.000000e+00 : f32
    %37 = vector.broadcast %cst_11 : f32 to vector<8x1xf32>
    %38 = arith.select %30, %24, %37 : vector<8x1xi1>, vector<8x1xf32>
    %39 = vector.shape_cast %38 : vector<8x1xf32> to vector<1x8x1xf32>
    %cst_12 = arith.constant dense<0.000000e+00> : vector<1xf32>
    %40 = vector.multi_reduction <add>, %39, %cst_12 [1, 2] : vector<1x8x1xf32> to vector<1xf32>
    %41 = vector.shape_cast %40 : vector<1xf32> to vector<1x1x1xf32>
    %42 = vector.extract %41[0, 0, 0] : f32 from vector<1x1x1xf32>
    %43 = tpu.iota {dimensions = array<i32: 2>} : vector<1x8x128xi32>
    %c0_i32 = arith.constant 0 : i32
    %44 = vector.broadcast %c0_i32 : i32 to vector<1x8x128xi32>
    %45 = arith.cmpi eq, %43, %44 : vector<1x8x128xi32>
    %c1_i32 = arith.constant 1 : i32
    %46 = vector.broadcast %c1_i32 : i32 to vector<1x8x128xi32>
    %47 = arith.cmpi eq, %43, %46 : vector<1x8x128xi32>
    %cst_13 = arith.constant 0.000000e+00 : f32
    %48 = vector.broadcast %42 : f32 to vector<1x8x128xf32>
    %49 = vector.broadcast %cst_13 : f32 to vector<1x8x128xf32>
    %50 = arith.select %47, %48, %49 : vector<1x8x128xi1>, vector<1x8x128xf32>
    %51 = vector.broadcast %36 : f32 to vector<1x8x128xf32>
    %52 = arith.select %45, %51, %50 : vector<1x8x128xi1>, vector<1x8x128xf32>
    %c0_14 = arith.constant 0 : index
    %c0_15 = arith.constant 0 : index
    %c0_16 = arith.constant 0 : index
    %53 = vector.load %arg3[%c0_14, %c0_15, %c0_16] : memref<1x8x128xf32, #tpu.memory_space<vmem>>, vector<1x8x128xf32>
    tpu.vector_store %arg3[%c0_14, %c0_15, %c0_16], %52 {strides = array<i32>} : memref<1x8x128xf32, #tpu.memory_space<vmem>>, vector<1x8x128xf32>,
    return
  }
  func.func @transform_0(%arg0: i32) -> (i32, i32) {
    %c0_i32 = arith.constant 0 : i32
    %c0_i32_0 = arith.constant 0 : i32
    return %arg0, %c0_i32 : i32, i32
  }
  func.func @transform_1(%arg0: i32) -> (i32, i32) {
    %c0_i32 = arith.constant 0 : i32
    %c0_i32_0 = arith.constant 0 : i32
    return %arg0, %c0_i32 : i32, i32
  }
  func.func @transform_2(%arg0: i32) -> (i32, i32, i32) {
    %c0_i32 = arith.constant 0 : i32
    %c0_i32_0 = arith.constant 0 : i32
    %c0_i32_1 = arith.constant 0 : i32
    return %arg0, %c0_i32, %c0_i32_0 : i32, i32, i32
  }
}

</mosaic_0001>

<bundles_post_ra>
// kernel: tpu_custom_call.1
= control target key start
LH: loop header
LB: loop body
LE: loop exit
PB: predicated region body
PF: predicated region fallthrough
CT: control target
= control target key end

     0   :  { %7 = vsyncpa [#allocation3], 0  ;;  %s590_s0 = inlined_call_operand.vmem [shape: f32[16,32], index: 0, kind: input, shape index: {}]   ;;  %s591_s1 = inlined_call_operand.vmem [shape: s32[16,1], index: 1, kind: input, shape index: {}]   ;;  %s592_s2 = inlined_call_operand.hbm [shape: f32[2,8,128], index: 2, kind: output, shape index: {}]  }
   0x1   :  { %9 = vsyncpa [#allocation3 + $0x1], 0  ;;  %s494_s9 = smov 0   ;;  %s496_s10 = smov 0  }
   0x2   :  { %s498_s11 = smov 0   ;;  %s500_s12 = smov 0  }
   0x3 LB: > { %s515_s13 = sadd.s32 4294967295, %s475_s12   ;;  %s349_s14 = sadd.s32 4294967294, %s475_s12   ;;  %s475_s12 = sphi %s500_s12, %s598_s12   ;;  %s471_s11 = sphi %s498_s11, %s597_s11   ;;  %s467_s10 = sphi %s496_s10, %s596_s10   ;;  %s463_s9 = sphi %s494_s9, %s595_s9  }
   0x4   : > { %s519_s15 = sadd.s32 1, %s475_s12   ;;  %s74_s16 = sadd.s32 1, %s471_s11 }
   0x5   : > { %s71_s17 = ssub.s32 %s475_s12, %s519_s15  ;;  %p84_p0 = scmp.ne.s32.totalorder %s471_s11, %s467_s10 }
   0x6   : > { %p72_p1 = scmp.eq.s32.totalorder %s71_s17, 0  ;;  %p85_p2 = scmp.eq.s32.totalorder %s515_s13, 1 }
   0x7   : > { %p90_p3 = scmp.ne.s32.totalorder %s467_s10, %s463_s9  ;;  %p91_p4 = scmp.eq.s32.totalorder %s349_s14, 1 }
   0x8   : > { %s530_s18 = scalar_select %p72_p1, %s471_s11, %s74_s16  }
   0x9   : > { %p532_p5 = por %p85_p2, %p84_p0  ;;  %p536_p6 = por %p91_p4, %p90_p3 }
   0xa   : > { %p352_p7 = scmp.ge.s32.totalorder %s475_s12, 1  ;;  %p123_p8 = scmp.lt.s32.totalorder %s475_s12, 3 }
   0xc   : > { %p124_p9 = pnand %p352_p7, %p123_p8 }
   0xd   : > { %p148_p10 = scmp.lt.s32.totalorder (!%p124_p9), %s515_s13, 1  ;;  %s358_s29 = sshll.u32 (!%p124_p9), %s515_s13, 3 }
   0xe   : > { %127 = sbr.rel (%p124_p9) target bundleno = 478 (0x1de), region = 28  ;;  %s145_s30 = sand.u32 (!%p124_p9), 1, %s467_s10  }
   0xf   : > { %s353_s3 = sshll.u32 (!%p124_p9), %s145_s30, 3  ;;  %s273_s6 = scalar_lea.hbm (!%p124_p9), %s592_s2, %s358_s29 }
  0x10   : > { %s147_s7 = scalar_lea.vmem (!%p124_p9), [#allocation2], %s353_s3  ;;  %s277_s16 = sshll.u32 (!%p124_p9), %s273_s6, 4  ;;  %s278_s16 = int_to_ptr.hbm [resolvable:$true] %s277_s16 }
  0x11   : > { %s275_s8 = sshll.u32 (!%p124_p9), %s147_s7, 4  ;;  %s276_s8 = int_to_ptr.vmem [resolvable:$true] %s275_s8 }
  0x13   : > { %v477_v0 = vmov 0   ;;  %v478_v1 = vmov 1.0   ;;  %s149_s21 = scalar_select %p148_p10, %s515_s13, 1  ;;  %vm158_vm0 = vcmask 261120   ;;  %v213_v9 = vlaneseq }
  0x14   : > { %408 = vset.pattern.permute.xlu0 %v477_v0  ;;  %203 = vmatpush.msra.mxu1 %v478_v1  ;;  %v229_v16 = vstv %s358_s29  ;;  %vm233_vm3 = vcmask 7168   ;;  %s263_s13 = scalar_lea.sflag [#allocation3], %s145_s30 }
  0x15   : > { %180 = vmatpush.msra.mxu0 %v478_v1  ;;  %s354_s22 = sshll.u32 %s149_s21, 3  ;;  %v214_v10 = vand.u32 127, %v213_v9  ;;  %v228_v15 = vshrl.u32 %v213_v9, 7  ;;  %s427_s21 = sshra.s32 %s278_s16, 4  ;;  %s428_s21 = int_to_ptr.hbm [resolvable:$true] %s427_s21 }
  0x16   : > { %204 = vmatpush.msra.mxu1 %v478_v1  ;;  %s151_s25 = scalar_lea.vmem %s590_s0, %s354_s22  ;;  %s155_s28 = scalar_lea.vmem %s591_s1, %s354_s22 }
  0x17   : > { %181 = vmatpush.msra.mxu0 %v478_v1  ;;  %v156_v2 = vld [vmem:[%s151_s25] sm:$0xff]  ;;  %v230_v17 = vadd.s32 %v229_v16, %v228_v15  ;;  %vm256_vm4 = vcmp.eq.s32.totalorder %v214_v10, 1  ;;  %vm255_vm5 = vcmp.eq.s32.totalorder %v214_v10, 0  ;;  %s429_s22 = scalar_lea.hbm %s428_s21, 8  ;;  %s433_s25 = scalar_lea.hbm %s592_s2, 16 }
  0x18   : > { %205 = vmatpush.msra.mxu1 %v478_v1  ;;  %v159_v3 = vsel %vm158_vm0, %v156_v2, -inf  ;;  %v157_v4 = vld [vmem:[%s155_s28] sm:$0xff]  ;;  %p430_p11 = scmp.ne.s32.totalorder %s428_s21, %s429_s22  ;;  %p434_p0 = scmp.lt.s32.totalorder %s428_s21, %s592_s2 }
  0x19   : > { %182 = vmatpush.msra.mxu0 %v478_v1  ;;  %160 = vmax.xlane.f32.xlu0 %v159_v3  ;;  %vm231_vm2 = vcmp.lt.s32.totalorder %v230_v17, 16  ;;  %p435_p1 = scmp.lt.s32.totalorder %s433_s25, %s429_s22 }
  0x1a   : > { %206 = vmatpush.msra.mxu1 %v478_v1  ;;  %p431_p12 = pnand %p430_p11, %p532_p5 }
  0x1b   : > { %183 = vmatpush.msra.mxu0 %v478_v1  ;;  %p436_p2 = por %p435_p1, %p434_p0 }
  0x1c   : > { %p432_p13 = pneg %p431_p12 }
  0x1e   : > { %p437_p3 = pnand %p436_p2, %p432_p13 }
  0x2d   : > { %216 = vperm.xlu0 %408, %v157_v4  }
  0x8c   : > { %v161_v5 = vpop.xlane.xlu0 %160 }
  0x8d   : > { %v162_v6 = vsub.f32 %v156_v2, %v161_v5 }
  0x8f   : > { %v163_v7 = vmul.f32 1.442695, %v162_v6  ;;  %357 = vmatmul.msk.f32.vlgmr.msra.gmra.mxu1 %vm158_vm0, %v162_v6 }
  0x91   : > { %409 = vpow2.f32 %v163_v7 }
  0x97   : > { %v410_v8 = vpop.eup %409 }
  0x98   : > { %356 = vmatmul.msk.f32.vlgmr.msra.gmra.mxu0 %vm158_vm0, %v410_v8 }
  0x9f   : > { %v217_v11 = vpop.permute.xlu0 %216 }
  0xa0   : > { %vm218_vm1 = vcmp.eq.s32.totalorder %v214_v10, %v217_v11 }
  0xa1   : > { %v219_v12 = vsel %vm218_vm1, %v162_v6, 0.0 }
  0xa2   : > { %v220_v13 = vsel %vm158_vm0, %v219_v12, 0.0 }
  0xa3   : > { %221 = vadd.xlane.f32.xlu1 %v220_v13 }
 0x10c   : > { %v208_v23 = vpop.f32.mrf.mxu1 }
 0x115   : > { %v185_v14 = vpop.f32.mrf.mxu0 }
 0x116   : > { %411 = vlog2.f32 %v185_v14  ;;  %v222_v20 = vpop.xlane.xlu1 %221 }
 0x11c   : > { %v412_v18 = vpop.eup %411 }
 0x11d   : > { %v212_v19 = vmul.f32 0.6931472, %v412_v18 }
 0x11f   : > { %v223_v21 = vmul.f32 32.0, %v212_v19  ;;  %v225_v22 = vsub.f32 %v212_v19, %v222_v20 }
 0x121   : > { %v244_v24 = vsel %vm231_vm2, %v225_v22, 0.0  ;;  %v224_v25 = vsub.f32 %v223_v21, %v208_v23 }
 0x122   : > { %v245_v26 = vsel %vm233_vm3, %v244_v24, 0.0 }
 0x123   : > { %246 = vadd.xlane.f32.xlu2 %v245_v26  ;;  %v232_v27 = vsel %vm231_vm2, %v224_v25, 0.0 }
 0x124   : > { %v234_v28 = vsel %vm233_vm3, %v232_v27, 0.0 }
 0x125   : > { %235 = vadd.xlane.f32.xlu1 %v234_v28 }
 0x196   : > { %v247_v29 = vpop.xlane.xlu2 %246 }
 0x197   : > { %v248_v30 = vrot.slane %v247_v29, 4 }
 0x198   : > { %v236_v31 = vpop.xlane.xlu1 %235 }
 0x199   : > { %v249_v32 = vadd.f32 %v248_v30, %v247_v29  ;;  %v237_v33 = vrot.slane %v236_v31, 4 }
 0x19b   : > { %v250_v34 = vrot.slane %v249_v32, 2  ;;  %v238_v35 = vadd.f32 %v237_v33, %v236_v31 }
 0x19d   : > { %v251_v36 = vadd.f32 %v250_v34, %v249_v32  ;;  %v239_v37 = vrot.slane %v238_v35, 2 }
 0x19f   : > { %v240_v38 = vadd.f32 %v239_v37, %v238_v35  ;;  %v252_v39 = vrot.slane %v251_v36, 1 }
 0x1a1   : > { %v241_v40 = vrot.slane %v240_v38, 1  ;;  %v253_v42 = vadd.f32 %v252_v39, %v251_v36 }
 0x1a3   : > { %v242_v41 = vadd.f32 %v241_v40, %v240_v38 }
 0x1a5   : > { %363 = vpush %v242_v41 }
 0x1a6   : > { %365 = vpush %v253_v42 }
 0x1d6   : > { %s364_s14 = spop %363 }
 0x1d7   : > { %v259_v43 = vstv %s364_s14  ;;  %s366_s17 = spop %365 }
 0x1d8   : > { %v257_v44 = vstv %s366_s17 }
 0x1d9   : > { %v258_v45 = vsel %vm256_vm4, %v257_v44, 0.0 }
 0x1da   : > { %v260_v46 = vsel %vm255_vm5, %v259_v43, %v258_v45 }
 0x1db   : > { %261 = vst [vmem:[%s147_s7] sm:$0xff] %v260_v46 }
 0x1dc   : > { %440 = shalt.err (!%p437_p3)
}
 0x1dd   : > { %367 = dma.vmem_to_hbm [thread:$0]  (%p532_p5), %s276_s8, 128, %s278_s16, %s263_s13  }
 0x1de PF: > { %p373_p4 = scmp.ge.s32.totalorder %s475_s12, 2  ;;  %s289_s28 = sand.u32 1, %s463_s9  }
 0x1df   : > { %s290_s29 = scalar_lea.sflag [#allocation3], %s289_s28 }
 0x1e0   : > { %p370_p7 = pnand %p373_p4, %p536_p6 }
 0x1e2   : > { %p371_p8 = pneg %p370_p7 }
 0x1e4   : > { %458 = dma.done.wait (%p371_p8), %s290_s29, 128  }
 0x1e5   : > { %460 = vsyncadd (%p371_p8), %s290_s29, 4294967168  ;;  %p12_p9 = scmp.ge.s32.totalorder %s519_s15, 4   ;;  %s595_s9 = smov %s467_s10 }
 0x1e6   : > { %s596_s10 = smov %s471_s11  ;;  %s597_s11 = smov %s530_s18 }
 0x1e7   : > { %s598_s12 = smov %s519_s15  ;;  %14 = sbr.rel (!%p12_p9) target bundleno = 3 (0x3), region = 66 }
 0x1ec   :  { %296 = vsyncpa [#allocation3], 1 }
 0x1ed   :  { %298 = vsyncpa [#allocation3 + $0x1], 1 }

</bundles_post_ra>
